<compile_context>
chip_gen: v5e
topology: v5e:2x2
jax: 0.10.0
libtpu: 0.0.40
codegen_flags: <defaults>
</compile_context>

<pallas_src>
import functools

import jax
import jax.numpy as jnp
from jax import lax
from jax.experimental import pallas as pl
from jax.experimental.pallas import tpu as pltpu


def _choose_block_b(batch, num_classes, itemsize):
    """Batch-tile size: multiple of 8, large enough to amortize per-step overhead,
    small enough that 2x double-buffered (TB, C) tiles fit comfortably in VMEM on
    every TPU generation (worst case v7x: 64 MiB physical / 32 MiB scoped)."""
    if batch <= 8:
        return batch  # single tile; block == full array keeps layout constraints trivial
    per_buffer_budget = 6 * 1024 * 1024  # x2 buffers ~= 12 MiB of VMEM for the logits
    tb = per_buffer_budget // max(1, num_classes * itemsize)
    tb = min(tb, 1024, batch)
    return max(8, (tb // 8) * 8)


def _focal_loss_kernel(x_ref, t_ref, o_ref, acc_ref, *, alpha, gamma, batch, block_b):
    # x_ref: (TB, C) logits, t_ref: (TB, 1) int32 targets,
    # o_ref: (1, 1) f32 output, acc_ref: (1, 1) f32 running sum.
    i = pl.program_id(0)

    @pl.when(i == 0)
    def _init():
        acc_ref[...] = jnp.zeros_like(acc_ref)

    x = x_ref[...].astype(jnp.float32)                       # (TB, C)
    t = t_ref[...]                                           # (TB, 1) int32

    # Numerically stable softmax pieces.
    m = jnp.max(x, axis=-1, keepdims=True)                   # (TB, 1)
    shifted = x - m
    denom = jnp.sum(jnp.exp(shifted), axis=-1, keepdims=True)  # (TB, 1)

    # z = logit[target] - rowmax, gathered via masked select (no f32 one-hot temp).
    col = lax.broadcasted_iota(jnp.int32, x.shape, 1)
    z = jnp.sum(jnp.where(col == t, shifted, 0.0), axis=-1, keepdims=True)

    ce = jnp.log(denom) - z                                  # -log p_t  (>= 0)
    p_t = jnp.exp(-ce)                                       # exact, guaranteed <= 1

    one_minus = 1.0 - p_t
    if float(gamma) == int(gamma) and gamma >= 0:
        focal_w = jnp.ones_like(one_minus)
        for _ in range(int(gamma)):                          # integer-power unroll
            focal_w = focal_w * one_minus
    else:
        focal_w = one_minus ** gamma
    loss = (alpha * focal_w) * ce                            # (TB, 1)

    # Mask padded rows of the (possibly partial) last tile.
    row = lax.broadcasted_iota(jnp.int32, loss.shape, 0) + i * block_b
    loss = jnp.where(row < batch, loss, 0.0)

    acc_ref[...] += jnp.sum(loss, axis=0, keepdims=True)

    @pl.when(i == pl.num_programs(0) - 1)
    def _finalize():
        o_ref[...] = acc_ref[...] / jnp.float32(batch)       # reduction='mean'


def focal_loss(inputs, targets, alpha=1.0, gamma=2.0):
    """inputs: [B, C] float (f32 or bf16), targets: [B] int. Returns scalar f32 (mean)."""
    b, c = inputs.shape
    targets2d = targets.astype(jnp.int32).reshape(b, 1)

    itemsize = jnp.dtype(inputs.dtype).itemsize
    tb = _choose_block_b(b, c, itemsize)
    grid = (pl.cdiv(b, tb),)

    kernel = functools.partial(
        _focal_loss_kernel, alpha=float(alpha), gamma=float(gamma), batch=b, block_b=tb
    )

    cost = pl.CostEstimate(
        flops=6 * b * c,
        transcendentals=b * c + 3 * b,
        bytes_accessed=b * c * itemsize + b * 4 + 4,
    )

    out = pl.pallas_call(
        kernel,
        out_shape=jax.ShapeDtypeStruct((1, 1), jnp.float32),
        grid=grid,
        in_specs=[
            pl.BlockSpec((tb, c), lambda i: (i, 0)),     # logits: batch-tiled, full class axis
            pl.BlockSpec((tb, 1), lambda i: (i, 0)),     # targets
        ],
        out_specs=pl.BlockSpec((1, 1), lambda i: (0, 0)),  # resident scalar accumulator/output
        scratch_shapes=[pltpu.VMEM((1, 1), jnp.float32)],
        compiler_params=pltpu.CompilerParams(
            dimension_semantics=("arbitrary",),          # carried accumulator across tiles
            vmem_limit_bytes=32 * 1024 * 1024,
        ),
        cost_estimate=cost,
    )(inputs, targets2d)
    return out[0, 0]


def _reference_focal_loss(inputs, targets, alpha=1.0, gamma=2.0):
    logits = inputs.astype(jnp.float32)
    logp = jax.nn.log_softmax(logits, axis=1)
    logp_t = jnp.take_along_axis(logp, targets[:, None], axis=1)[:, 0]
    p_t = jnp.exp(logp_t)
    ce = -logp_t
    loss = alpha * (1.0 - p_t) ** gamma * ce
    return jnp.mean(loss)


if __name__ == "__main__":
    key = jax.random.PRNGKey(0)
    k1, k2 = jax.random.split(key)

    # Small shapes consistent with the module ([batch, num_classes]); batch=10 is
    # deliberately not a multiple of the tile size so the partial-tile mask and the
    # init/accumulate/finalize path across multiple grid steps are all exercised.
    batch, num_classes = 10, 32
    inputs = jax.random.normal(k1, (batch, num_classes), dtype=jnp.float32)
    targets = jax.random.randint(k2, (batch,), 0, num_classes, dtype=jnp.int32)

    out = focal_loss(inputs, targets, alpha=1.0, gamma=2.0)
    out = jax.block_until_ready(out)

    ref = _reference_focal_loss(inputs, targets, alpha=1.0, gamma=2.0)
    assert jnp.allclose(out, ref, rtol=1e-4, atol=1e-6), (out, ref)

    print("KERNEL_OK")
</pallas_src>

<mosaic_0001>
module attributes {stable_mosaic.version = 11 : i64} {
  func.func @_focal_loss_kernel(%arg0: i32, %arg1: memref<8x32xf32, #tpu.memory_space<vmem>>, %arg2: memref<8x1xi32, #tpu.memory_space<vmem>>, %arg3: memref<1x1xf32, #tpu.memory_space<vmem>>, %arg4: memref<1x1xf32, #tpu.memory_space<vmem>>) attributes {dimension_semantics = [#tpu.dimension_semantics<arbitrary>], iteration_bounds = array<i64: 2>, scalar_prefetch = 0 : i64, scratch_operands = 1 : i64, tpu.core_type = #tpu.core_type<tc>, window_params = [{transform_indices = @transform_0, window_bounds = array<i64: 8, 32>}, {transform_indices = @transform_1, window_bounds = array<i64: 8, 1>}, {pipeline_mode = #tpu.pipeline_mode<synchronous>, transform_indices = @transform_2, window_bounds = array<i64: 1, 1>}]} {
    %c0_i32 = arith.constant 0 : i32
    %0 = arith.cmpi eq, %arg0, %c0_i32 : i32
    %1 = arith.extui %0 : i1 to i32
    %c0_i32_0 = arith.constant 0 : i32
    %2 = arith.cmpi ne, %1, %c0_i32_0 : i32
    scf.if %2 {
      %cst_18 = arith.constant 0.000000e+00 : f32
      %48 = vector.broadcast %cst_18 : f32 to vector<1x1xf32>
      %c0_19 = arith.constant 0 : index
      %c0_20 = arith.constant 0 : index
      %49 = vector.load %arg4[%c0_19, %c0_20] : memref<1x1xf32, #tpu.memory_space<vmem>>, vector<1x1xf32>
      tpu.vector_store %arg4[%c0_19, %c0_20], %48 {strides = array<i32>} : memref<1x1xf32, #tpu.memory_space<vmem>>, vector<1x1xf32>,
    } else {
    }
    %c0 = arith.constant 0 : index
    %c0_1 = arith.constant 0 : index
    %3 = vector.load %arg1[%c0, %c0_1] : memref<8x32xf32, #tpu.memory_space<vmem>>, vector<8x32xf32>
    %c0_2 = arith.constant 0 : index
    %c0_3 = arith.constant 0 : index
    %4 = vector.load %arg2[%c0_2, %c0_3] : memref<8x1xi32, #tpu.memory_space<vmem>>, vector<8x1xi32>
    %cst = arith.constant dense<0xFF800000> : vector<8xf32>
    %5 = vector.multi_reduction <maximumf>, %3, %cst [1] : vector<8x32xf32> to vector<8xf32>
    %6 = vector.shape_cast %5 : vector<8xf32> to vector<8x1xf32>
    %7 = vector.broadcast %6 : vector<8x1xf32> to vector<8x32xf32>
    %8 = arith.subf %3, %7 : vector<8x32xf32>
    %9 = math.exp %8 : vector<8x32xf32>
    %cst_4 = arith.constant dense<0.000000e+00> : vector<8xf32>
    %10 = vector.multi_reduction <add>, %9, %cst_4 [1] : vector<8x32xf32> to vector<8xf32>
    %11 = vector.shape_cast %10 : vector<8xf32> to vector<8x1xf32>
    %12 = tpu.iota {dimensions = array<i32: 1>} : vector<8x32xi32>
    %13 = vector.broadcast %4 : vector<8x1xi32> to vector<8x32xi32>
    %14 = arith.cmpi eq, %12, %13 : vector<8x32xi32>
    %cst_5 = arith.constant 0.000000e+00 : f32
    %15 = vector.broadcast %cst_5 : f32 to vector<8x32xf32>
    %16 = arith.select %14, %8, %15 : vector<8x32xi1>, vector<8x32xf32>
    %cst_6 = arith.constant dense<0.000000e+00> : vector<8xf32>
    %17 = vector.multi_reduction <add>, %16, %cst_6 [1] : vector<8x32xf32> to vector<8xf32>
    %18 = vector.shape_cast %17 : vector<8xf32> to vector<8x1xf32>
    %19 = math.log %11 : vector<8x1xf32>
    %20 = arith.subf %19, %18 : vector<8x1xf32>
    %cst_7 = arith.constant 0.000000e+00 : f32
    %21 = vector.broadcast %cst_7 : f32 to vector<8x1xf32>
    %22 = arith.subf %21, %20 : vector<8x1xf32>
    %23 = math.exp %22 : vector<8x1xf32>
    %cst_8 = arith.constant 1.000000e+00 : f32
    %24 = vector.broadcast %cst_8 : f32 to vector<8x1xf32>
    %25 = arith.subf %24, %23 : vector<8x1xf32>
    %cst_9 = arith.constant 1.000000e+00 : f32
    %26 = vector.broadcast %cst_9 : f32 to vector<8x1xf32>
    %27 = arith.mulf %26, %25 : vector<8x1xf32>
    %28 = arith.mulf %27, %25 : vector<8x1xf32>
    %cst_10 = arith.constant 1.000000e+00 : f32
    %29 = vector.broadcast %cst_10 : f32 to vector<8x1xf32>
    %30 = arith.mulf %29, %28 : vector<8x1xf32>
    %31 = arith.mulf %30, %20 : vector<8x1xf32>
    %32 = tpu.iota {dimensions = array<i32: 0>} : vector<8x1xi32>
    %c8_i32 = arith.constant 8 : i32
    %33 = arith.muli %arg0, %c8_i32 : i32
    %34 = vector.broadcast %33 : i32 to vector<8x1xi32>
    %35 = arith.addi %32, %34 : vector<8x1xi32>
    %c10_i32 = arith.constant 10 : i32
    %36 = vector.broadcast %c10_i32 : i32 to vector<8x1xi32>
    %37 = arith.cmpi slt, %35, %36 : vector<8x1xi32>
    %cst_11 = arith.constant 0.000000e+00 : f32
    %38 = vector.broadcast %cst_11 : f32 to vector<8x1xf32>
    %39 = arith.select %37, %31, %38 : vector<8x1xi1>, vector<8x1xf32>
    %c0_12 = arith.constant 0 : index
    %c0_13 = arith.constant 0 : index
    %40 = vector.load %arg4[%c0_12, %c0_13] : memref<1x1xf32, #tpu.memory_space<vmem>>, vector<1x1xf32>
    %cst_14 = arith.constant dense<0.000000e+00> : vector<1xf32>
    %41 = vector.multi_reduction <add>, %39, %cst_14 [0] : vector<8x1xf32> to vector<1xf32>
    %42 = vector.shape_cast %41 : vector<1xf32> to vector<1x1xf32>
    %43 = arith.addf %40, %42 : vector<1x1xf32>
    %c0_15 = arith.constant 0 : index
    %c0_16 = arith.constant 0 : index
    %44 = vector.load %arg4[%c0_15, %c0_16] : memref<1x1xf32, #tpu.memory_space<vmem>>, vector<1x1xf32>
    tpu.vector_store %arg4[%c0_15, %c0_16], %43 {strides = array<i32>} : memref<1x1xf32, #tpu.memory_space<vmem>>, vector<1x1xf32>,
    %c1_i32 = arith.constant 1 : i32
    %45 = arith.cmpi eq, %arg0, %c1_i32 : i32
    %46 = arith.extui %45 : i1 to i32
    %c0_i32_17 = arith.constant 0 : i32
    %47 = arith.cmpi ne, %46, %c0_i32_17 : i32
    scf.if %47 {
      %c0_18 = arith.constant 0 : index
      %c0_19 = arith.constant 0 : index
      %48 = vector.load %arg4[%c0_18, %c0_19] : memref<1x1xf32, #tpu.memory_space<vmem>>, vector<1x1xf32>
      %cst_20 = arith.constant 1.000000e+01 : f32
      %49 = vector.broadcast %cst_20 : f32 to vector<1x1xf32>
      %50 = arith.divf %48, %49 : vector<1x1xf32>
      %c0_21 = arith.constant 0 : index
      %c0_22 = arith.constant 0 : index
      %51 = vector.load %arg3[%c0_21, %c0_22] : memref<1x1xf32, #tpu.memory_space<vmem>>, vector<1x1xf32>
      tpu.vector_store %arg3[%c0_21, %c0_22], %50 {strides = array<i32>} : memref<1x1xf32, #tpu.memory_space<vmem>>, vector<1x1xf32>,
    } else {
    }
    return
  }
  func.func @transform_0(%arg0: i32) -> (i32, i32) {
    %c0_i32 = arith.constant 0 : i32
    %c0_i32_0 = arith.constant 0 : i32
    return %arg0, %c0_i32 : i32, i32
  }
  func.func @transform_1(%arg0: i32) -> (i32, i32) {
    %c0_i32 = arith.constant 0 : i32
    %c0_i32_0 = arith.constant 0 : i32
    return %arg0, %c0_i32 : i32, i32
  }
  func.func @transform_2(%arg0: i32) -> (i32, i32) {
    %c0_i32 = arith.constant 0 : i32
    %c0_i32_0 = arith.constant 0 : i32
    %c0_i32_1 = arith.constant 0 : i32
    return %c0_i32, %c0_i32_0 : i32, i32
  }
}

</mosaic_0001>

<bundles_post_ra>
// kernel: tpu_custom_call.1
= control target key start
LH: loop header
LB: loop body
LE: loop exit
PB: predicated region body
PF: predicated region fallthrough
CT: control target
= control target key end

     0   :  { %7 = vsyncpa [#allocation4], 0  ;;  %s371_s9 = smov 0   ;;  %s404_s0 = inlined_call_operand.vmem [shape: f32[10,32], index: 0, kind: input, shape index: {}]   ;;  %s405_s1 = inlined_call_operand.vmem [shape: s32[10,1], index: 1, kind: input, shape index: {}]   ;;  %s406_s2 = inlined_call_operand.hbm [shape: f32[1,1], index: 2, kind: output, shape index: {}]  }
   0x1 LB: > { %s377_s10 = sadd.s32 4294967295, %s350_s9   ;;  %p275_p0 = scmp.ge.s32.totalorder %s350_s9, 1  ;;  %s350_s9 = sphi %s371_s9, %s13_s9  }
   0x2   : > { %p116_p1 = scmp.lt.s32.totalorder %s350_s9, 3 }
   0x4   : > { %p117_p2 = pnand %p275_p0, %p116_p1 }
   0x5   : > { %p136_p3 = scmp.lt.s32.totalorder (!%p117_p2), %s377_s10, 1  ;;  %p278_p4 = scmp.ne.s32.totalorder (!%p117_p2), %s377_s10, 0 }
   0x6   : > { %120 = sbr.rel (%p117_p2) target bundleno = 335 (0x14f), region = 28 }
   0xb   : > { %s137_s11 = scalar_select %p136_p3, %s377_s10, 1 }
   0xc   : > { %147 = sbr.rel (%p278_p4) target bundleno = 19 (0x13), region = 32 }
   0xd   : > { %s276_s12 = sshll.u32 %s137_s11, 3 }
   0xe   : > { %s139_s15 = scalar_lea.vmem %s404_s0, %s276_s12  ;;  %s143_s18 = scalar_lea.vmem %s405_s1, %s276_s12 }
  0x11   : > { %vm148_vm0 = vcmask 0   ;;  %v352_v0 = vmov 0.0  }
  0x12   : > { %149 = vst.msk [vmem:[#allocation2] sm:$0x1] %vm148_vm0, %v352_v0 }
  0x13 PF: > { %v150_v1 = vld [vmem:[%s139_s15] sm:$0xff]  ;;  %vm152_vm1 = vcmask 261120   ;;  %v353_v3 = vmov 0   ;;  %v162_v10 = vlaneseq  ;;  %s279_s19 = sshll.u32 %s377_s10, 3  ;;  %vm196_vm4 = vcmask 0   ;;  %p280_p5 = scmp.ne.s32.totalorder %s377_s10, 1 }
  0x14   : > { %v153_v2 = vsel %vm152_vm1, %v150_v1, -inf  ;;  %303 = vset.pattern.permute.xlu0 %v353_v3  ;;  %v151_v4 = vld [vmem:[%s143_s18] sm:$0xff]  ;;  %v184_v23 = vstv %s279_s19 }
  0x15   : > { %154 = vmax.xlane.f32.xlu0 %v153_v2  ;;  %v163_v11 = vand.u32 127, %v162_v10  ;;  %v182_v22 = vshrl.u32 %v162_v10, 7 }
  0x17   : > { %v185_v25 = vadd.s32 %v184_v23, %v182_v22 }
  0x19   : > { %vm186_vm3 = vcmp.lt.s32.totalorder %v185_v25, 10  ;;  %v188_v35 = vld [vmem:[#allocation2] sm:$0x1] }
  0x29   : > { %165 = vperm.xlu0 %303, %v151_v4  }
  0x88   : > { %v155_v5 = vpop.xlane.xlu0 %154 }
  0x89   : > { %v156_v6 = vsub.f32 %v150_v1, %v155_v5 }
  0x8b   : > { %v157_v7 = vmul.f32 1.442695, %v156_v6 }
  0x8d   : > { %304 = vpow2.f32 %v157_v7 }
  0x93   : > { %v305_v8 = vpop.eup %304 }
  0x94   : > { %v159_v9 = vsel %vm152_vm1, %v305_v8, 0.0 }
  0x95   : > { %160 = vadd.xlane.f32.xlu1 %v159_v9 }
  0x9b   : > { %v166_v12 = vpop.permute.xlu0 %165 }
  0x9c   : > { %vm167_vm2 = vcmp.eq.s32.totalorder %v163_v11, %v166_v12 }
  0x9d   : > { %v168_v13 = vsel %vm167_vm2, %v156_v6, 0.0 }
  0x9e   : > { %v169_v14 = vsel %vm152_vm1, %v168_v13, 0.0 }
  0x9f   : > { %170 = vadd.xlane.f32.xlu1 %v169_v14 }
 0x108   : > { %v161_v15 = vpop.xlane.xlu1 %160 }
 0x109   : > { %306 = vlog2.f32 %v161_v15 }
 0x10f   : > { %v307_v16 = vpop.eup %306 }
 0x110   : > { %v173_v17 = vmul.f32 0.6931472, %v307_v16 }
 0x112   : > { %v171_v18 = vpop.xlane.xlu1 %170 }
 0x113   : > { %v174_v19 = vsub.f32 %v173_v17, %v171_v18 }
 0x115   : > { %v175_v20 = vsub.f32 0.0, %v174_v19 }
 0x117   : > { %v176_v21 = vmul.f32 1.442695, %v175_v20 }
 0x119   : > { %308 = vpow2.f32 %v176_v21 }
 0x11f   : > { %v309_v24 = vpop.eup %308 }
 0x120   : > { %v178_v26 = vsub.f32 1.0, %v309_v24 }
 0x122   : > { %v179_v27 = vmul.f32 %v178_v26, %v178_v26 }
 0x124   : > { %v180_v28 = vmul.f32 %v179_v27, %v174_v19 }
 0x126   : > { %v187_v29 = vsel %vm186_vm3, %v180_v28, 0.0 }
 0x127   : > { %v189_v30 = vrot.slane %v187_v29, 4 }
 0x129   : > { %v190_v31 = vadd.f32 %v189_v30, %v187_v29 }
 0x12b   : > { %v191_v32 = vrot.slane %v190_v31, 2 }
 0x12d   : > { %v192_v33 = vadd.f32 %v191_v32, %v190_v31 }
 0x12f   : > { %v193_v34 = vrot.slane %v192_v33, 1 }
 0x131   : > { %v194_v36 = vadd.f32 %v193_v34, %v192_v33  ;;  %201 = sbr.rel (%p280_p5) target bundleno = 330 (0x14a), region = 36 }
 0x133   : > { %v195_v37 = vadd.f32 %v194_v36, %v188_v35 }
 0x135   : > { %197 = vst.msk [vmem:[#allocation2] sm:$0x1] %vm196_vm4, %v195_v37 }
 0x136   : > { %v354_v38 = vmov 10.0  }
 0x137   : > { %310 = vrcp.f32 %v354_v38 }
 0x13c   : > { %v202_v43 = vld [vmem:[#allocation2] sm:$0x1] }
 0x13d   : > { %v311_v39 = vpop.eup %310 }
 0x13e   : > { %v204_v40 = vmul.f32 10.0, %v311_v39  ;;  %vm208_vm5 = vweird.f32 %v311_v39 }
 0x140   : > { %v205_v41 = vsub.f32 1.0, %v204_v40 }
 0x142   : > { %v206_v42 = vmul.f32 %v311_v39, %v205_v41 }
 0x144   : > { %v207_v44 = vadd.f32 %v311_v39, %v206_v42 }
 0x146   : > { %v209_v45 = vsel %vm208_vm5, %v311_v39, %v207_v44 }
 0x147   : > { %v210_v46 = vmul.f32 %v209_v45, %v202_v43 }
 0x149   : > { %211 = vst.msk [vmem:[#allocation3] sm:$0x1] %vm196_vm4, %v210_v46 }
 0x14a PF: > { %p289_p6 = scmp.eq.s32.totalorder %s377_s10, 1  ;;  %s355_s20 = smov [#allocation3]  }
 0x14b   : > { %s218_s21 = sshll.u32 %s355_s20, 4  ;;  %s220_s24 = sshll.u32 %s406_s2, 4  ;;  %s219_s21 = int_to_ptr.vmem [resolvable:$true] %s218_s21  ;;  %s221_s24 = int_to_ptr.hbm [resolvable:$true] %s220_s24 }
 0x14c   : > { %286 = dma.vmem_to_hbm [thread:$0]  (%p289_p6), %s219_s21, 16, %s221_s24, [#allocation4]  }
 0x14d   : > { %345 = dma.done.wait (%p289_p6), [#allocation4], 16  }
 0x14e   : > { %347 = vsyncadd (%p289_p6), [#allocation4], 4294967280 }
 0x14f PF: > { %s13_s9 = sadd.s32 1, %s350_s9  }
 0x150   : > { %p10_p7 = scmp.ge.s32.totalorder %s13_s9, 4  }
 0x152   :  { %12 = sbr.rel (!%p10_p7) target bundleno = 1 (0x1), region = 66 }
 0x157   :  { %234 = vsyncpa [#allocation4], 1 }
 0x158   :  { %236 = vsyncpa [#allocation4 + $0x1], 1 }

</bundles_post_ra>
